<compile_context>
chip_gen: v7x
topology: tpu7x:2x2x1
jax: 0.10.0
libtpu: 0.0.40
codegen_flags: <defaults>
</compile_context>

<pallas_src>
import functools
import math

import jax
import jax.numpy as jnp
from jax import lax
from jax.experimental import pallas as pl
from jax.experimental.pallas import tpu as pltpu


_INT32_MIN = jnp.iinfo(jnp.int32).min
_SEARCH_STEPS = 16     # 16-bit threshold space -> 16 bisection steps converge
_SEARCH_UNROLL = 4


def _sortable_key_from_bits(bits):
    """Monotone involution between IEEE-754 float32 bits and sortable int32."""
    return jnp.where(bits < 0, jnp.int32(_INT32_MIN) - bits, bits)


def _topk_threshold(key, k):
    """Per-row threshold t (multiple of 2^16 in sortable-key space) such that
    count(key >= t) >= k and count(key >= t + 2^16) < k.   (R, L) -> (R, 1).

    16 bisection steps over the top-16 bits of the sortable key; elements tied
    at 16-bit granularity are all kept (>= k survivors), matching ProbSparse
    semantics.  The count is accumulated in float32 (exact for L <= 2**24).
    """
    rows = key.shape[0]
    kf = jnp.float32(k)

    def step(carry):
        lo, hi = carry
        lo1 = lo + 1
        # ceil((lo + hi) / 2), overflow-safe bitwise midpoint.
        mid = (lo1 & hi) + ((lo1 ^ hi) >> 1)
        cnt = jnp.sum((key >= (mid << 16)).astype(jnp.float32),
                      axis=-1, keepdims=True)
        pred = cnt >= kf
        return jnp.where(pred, mid, lo), jnp.where(pred, hi, mid - 1)

    def body(_, carry):
        for _ in range(_SEARCH_UNROLL):   # manual 4x unroll inside fori_loop
            carry = step(carry)
        return carry

    lo0 = jnp.full((rows, 1), -(1 << 15), jnp.int32)
    hi0 = jnp.full((rows, 1), (1 << 15) - 1, jnp.int32)
    lo, _ = lax.fori_loop(0, _SEARCH_STEPS // _SEARCH_UNROLL, body, (lo0, hi0))
    return lo << 16


# ----------------------------- kernels -----------------------------

def _qkv_proj_kernel(x_ref, wqkv_ref, bqkv_ref, q_ref, kt_ref, v_ref,
                     *, D, mm_dtype):
    x = x_ref[0].astype(mm_dtype)                                    # (tl, D)
    qkv = jnp.dot(x, wqkv_ref[...],
                  preferred_element_type=jnp.float32) + bqkv_ref[...]
    q_ref[0] = qkv[:, :D].astype(mm_dtype)
    kt_ref[0] = qkv[:, D:2 * D].astype(mm_dtype).T                   # (D, tl)
    v_ref[0] = qkv[:, 2 * D:3 * D].astype(mm_dtype)


def _attention_layer_kernel(x_ref, q_ref, kt_ref, v_ref, wout_ref, bout_ref,
                            gamma_ref, beta_ref, o_ref,
                            *, H, d_k, top_k, scale, eps, mm_dtype):
    x = x_ref[0]                          # (tq, D) f32 (residual path)
    q = q_ref[0]                          # (tq, D) bf16
    kt = kt_ref[0]                        # (D, L)  bf16 (pre-transposed K)
    v = v_ref[0]                          # (L, D)  bf16
    L = kt.shape[1]

    acc = jnp.zeros(x.shape, jnp.float32)
    # TODO(synk): for d_k < 128 the per-head lane slices below are sub-tile;
    # zero-padding the per-head Q/K width to 128 would remove the relayouts.
    for h in range(H):
        c0 = h * d_k
        q_h = q[:, c0:c0 + d_k]           # (tq, d_k)
        kt_h = kt[c0:c0 + d_k, :]         # (d_k, L)
        v_h = v[:, c0:c0 + d_k]           # (L, d_k)

        # Lane-dense scores, no in-kernel transpose.
        s = jnp.dot(q_h, kt_h, preferred_element_type=jnp.float32) * scale
        m = jnp.max(s, axis=-1, keepdims=True)       # top-1 is always kept

        if top_k < L:
            # Single live (tq, L) temporary across the search: the sortable key.
            key = _sortable_key_from_bits(pltpu.bitcast(s, jnp.int32))
            thresh = _topk_threshold(key, top_k)
            s = pltpu.bitcast(_sortable_key_from_bits(key), jnp.float32)
            e = jnp.where(key >= thresh, jnp.exp(s - m), 0.0)
        else:
            e = jnp.exp(s - m)
        attn = e * pl.reciprocal(jnp.sum(e, axis=-1, keepdims=True), approx=True)

        ctx = jnp.dot(attn.astype(mm_dtype), v_h,
                      preferred_element_type=jnp.float32)            # (tq, d_k)
        # Fused per-head output projection: lane-dense (tq, D) accumulate.
        acc = acc + jnp.dot(ctx.astype(mm_dtype), wout_ref[c0:c0 + d_k, :],
                            preferred_element_type=jnp.float32)

    res = acc + bout_ref[...] + x
    mean = jnp.mean(res, axis=-1, keepdims=True)
    var = jnp.mean((res - mean) ** 2, axis=-1, keepdims=True)
    y = (res - mean) * lax.rsqrt(var + eps)
    o_ref[0] = (y * gamma_ref[...] + beta_ref[...]).astype(o_ref.dtype)


def _layer_norm_kernel(x_ref, gamma_ref, beta_ref, o_ref, *, eps):
    x = x_ref[0]
    mean = jnp.mean(x, axis=-1, keepdims=True)
    var = jnp.mean((x - mean) ** 2, axis=-1, keepdims=True)
    y = (x - mean) * lax.rsqrt(var + eps)
    o_ref[0] = (y * gamma_ref[...] + beta_ref[...]).astype(o_ref.dtype)


# ----------------------------- wrappers -----------------------------

def _vmem_capacity_bytes():
    """Physical VMEM per TensorCore (128 MiB on v5e/v6e, 64 MiB on v7x)."""
    try:
        cap = getattr(pltpu.get_tpu_info(), "vmem_capacity_bytes", None)
        if cap:
            return int(cap)
    except Exception:
        pass
    return 128 * 1024 * 1024


def _pick_tile(L, max_tile):
    t = min(L, max_tile)
    for cand in range(t, 0, -1):
        if L % cand == 0 and (cand % 8 == 0 or cand == L):
            return cand
    return L


def _shrink_tile(L, tile, est_fn, budget):
    while tile > 8 and est_fn(tile) > budget:
        new_tile = _pick_tile(L, tile // 2)
        if new_tile >= tile:
            break
        tile = new_tile
    return tile


def _vmem_limit(est, budget):
    return int(min(max(2 * est, 8 * 1024 * 1024), budget))


def _qkv_projection(x, wqkv, bqkv, *, matmul_dtype, budget, max_l_tile=512):
    B, L, D = x.shape
    mm_b = jnp.dtype(matmul_dtype).itemsize

    def est_bytes(tl):
        return (2 * tl * D * 4                 # x tile (double-buffered)
                + 2 * 3 * D * D * mm_b         # wqkv
                + 2 * 3 * D * 4                # bqkv
                + 2 * 3 * tl * D * mm_b        # Q / K^T / V output tiles
                + 2 * tl * 3 * D * 4)          # f32 qkv temporary

    tl = _shrink_tile(L, _pick_tile(L, max_l_tile), est_bytes, budget)
    nl = L // tl
    kernel = functools.partial(_qkv_proj_kernel, D=D, mm_dtype=matmul_dtype)

    return pl.pallas_call(
        kernel,
        out_shape=(jax.ShapeDtypeStruct((B, L, D), matmul_dtype),   # Q
                   jax.ShapeDtypeStruct((B, D, L), matmul_dtype),   # K^T
                   jax.ShapeDtypeStruct((B, L, D), matmul_dtype)),  # V
        grid_spec=pltpu.PrefetchScalarGridSpec(
            num_scalar_prefetch=0,
            grid=(B, nl),
            in_specs=[pl.BlockSpec((1, tl, D), lambda b, li: (b, li, 0)),
                      pl.BlockSpec((D, 3 * D), lambda b, li: (0, 0)),
                      pl.BlockSpec((1, 3 * D), lambda b, li: (0, 0))],
            out_specs=[pl.BlockSpec((1, tl, D), lambda b, li: (b, li, 0)),
                       pl.BlockSpec((1, D, tl), lambda b, li: (b, 0, li)),
                       pl.BlockSpec((1, tl, D), lambda b, li: (b, li, 0))],
        ),
        compiler_params=pltpu.CompilerParams(
            dimension_semantics=("parallel", "parallel"),
            vmem_limit_bytes=_vmem_limit(est_bytes(tl), budget)),
    )(x, wqkv, bqkv)


def informer_attention_layer(x, params, n_heads, *, eps=1e-5,
                             matmul_dtype=jnp.bfloat16, max_q_tile=None):
    B, L, D = x.shape
    assert D % n_heads == 0
    assert L <= (1 << 24), "f32 survivor count in the top-k search needs L <= 2**24"
    d_k = D // n_heads
    scale = 1.0 / math.sqrt(d_k)
    top_k = max(1, L // 4)
    mm_b = jnp.dtype(matmul_dtype).itemsize

    cap = _vmem_capacity_bytes()
    budget = cap * 3 // 4          # headroom for compiler scratch (v7x: ~48 MiB)
    if max_q_tile is None:
        max_q_tile = 512 if cap >= 96 * 1024 * 1024 else 256

    x = x.astype(jnp.float32)
    wqkv = params["wqkv"].astype(matmul_dtype)
    wout = params["wout"].astype(matmul_dtype)
    bqkv = params["bqkv"].reshape(1, 3 * D).astype(jnp.float32)
    bout = params["bout"].reshape(1, D).astype(jnp.float32)
    gamma = params["gamma"].reshape(1, D).astype(jnp.float32)
    beta = params["beta"].reshape(1, D).astype(jnp.float32)

    # Fully-parallel QKV projection kernel (bf16 Q, V, pre-transposed K^T).
    q, kt, v = _qkv_projection(x, wqkv, bqkv,
                               matmul_dtype=matmul_dtype, budget=budget)

    # Conservative (double-buffered) footprint estimate for the attention kernel.
    def est_bytes(tq):
        return (2 * tq * D * 4                 # x residual tile
                + 2 * tq * D * mm_b            # Q tile
                + 2 * (2 * L * D + D * D) * mm_b   # K^T, V, Wout
                + 16 * D * 4                   # biases / LN params
                + 2 * tq * D * 4               # output tile
                + 4 * tq * L * 4               # score-sized temporaries
                + 2 * tq * D * 4)              # f32 accumulator + misc

    tq = _shrink_tile(L, _pick_tile(L, max_q_tile), est_bytes, budget)
    nq = L // tq

    kernel = functools.partial(
        _attention_layer_kernel, H=n_heads, d_k=d_k, top_k=top_k,
        scale=scale, eps=eps, mm_dtype=matmul_dtype)

    def call(single_buffer_consts):
        def spec(shape, index_map, constant):
            if constant and single_buffer_consts and hasattr(pl, "Buffered"):
                return pl.BlockSpec(shape, index_map,
                                    pipeline_mode=pl.Buffered(buffer_count=1))
            return pl.BlockSpec(shape, index_map)

        return pl.pallas_call(
            kernel,
            out_shape=jax.ShapeDtypeStruct((B, L, D), jnp.float32),
            grid_spec=pltpu.PrefetchScalarGridSpec(
                num_scalar_prefetch=0,
                grid=(B, nq),
                in_specs=[
                    spec((1, tq, D), lambda b, qi: (b, qi, 0), False),  # x tile
                    spec((1, tq, D), lambda b, qi: (b, qi, 0), False),  # Q tile
                    spec((1, D, L), lambda b, qi: (b, 0, 0), True),     # K^T
                    spec((1, L, D), lambda b, qi: (b, 0, 0), True),     # V
                    spec((D, D), lambda b, qi: (0, 0), True),           # Wout
                    spec((1, D), lambda b, qi: (0, 0), True),           # bout
                    spec((1, D), lambda b, qi: (0, 0), True),           # gamma
                    spec((1, D), lambda b, qi: (0, 0), True),           # beta
                ],
                out_specs=pl.BlockSpec((1, tq, D), lambda b, qi: (b, qi, 0)),
            ),
            compiler_params=pltpu.CompilerParams(
                dimension_semantics=("parallel", "parallel"),
                vmem_limit_bytes=_vmem_limit(est_bytes(tq), budget)),
        )(x, q, kt, v, wout, bout, gamma, beta)

    try:
        return call(True)
    except Exception:
        # pl.Buffered(1) not supported by this JAX build: default buffering.
        return call(False)


def layer_norm(x, gamma, beta, *, eps=1e-5, max_tile=512):
    B, L, D = x.shape
    t = _pick_tile(L, max_tile)
    n = L // t
    kernel = functools.partial(_layer_norm_kernel, eps=eps)
    return pl.pallas_call(
        kernel,
        out_shape=jax.ShapeDtypeStruct((B, L, D), jnp.float32),
        grid_spec=pltpu.PrefetchScalarGridSpec(
            num_scalar_prefetch=0,
            grid=(B, n),
            in_specs=[pl.BlockSpec((1, t, D), lambda b, i: (b, i, 0)),
                      pl.BlockSpec((1, D), lambda b, i: (0, 0)),
                      pl.BlockSpec((1, D), lambda b, i: (0, 0))],
            out_specs=pl.BlockSpec((1, t, D), lambda b, i: (b, i, 0)),
        ),
        compiler_params=pltpu.CompilerParams(
            dimension_semantics=("parallel", "parallel")),
    )(x.astype(jnp.float32),
      gamma.reshape(1, D).astype(jnp.float32),
      beta.reshape(1, D).astype(jnp.float32))


def voformer_encoder(x, layer_params, norm_params, n_heads, num_layers, *,
                     eps=1e-5, matmul_dtype=jnp.bfloat16):
    """num_layers applications of the shared encoder layer, then LayerNorm."""
    src = x.astype(jnp.float32)
    for _ in range(num_layers):
        src = informer_attention_layer(src, layer_params, n_heads, eps=eps,
                                       matmul_dtype=matmul_dtype)
    return layer_norm(src, norm_params["gamma"], norm_params["beta"], eps=eps)


# ----------------------------- pure-JAX reference -----------------------------

def reference_layer(x, p, n_heads, eps=1e-5, matmul_dtype=jnp.float32):
    """Mirrors the kernel's matmul precision and its 16-bit-bucket top-k."""
    B, L, D = x.shape
    d_k = D // n_heads
    scale = 1.0 / math.sqrt(d_k)
    top_k = max(1, L // 4)
    c = lambda a: a.astype(matmul_dtype)

    qkv = jnp.dot(c(x), c(p["wqkv"]),
                  preferred_element_type=jnp.float32) + p["bqkv"]
    qkv = qkv.reshape(B, L, 3, n_heads, d_k)
    q = c(qkv[:, :, 0]).transpose(0, 2, 1, 3)        # (B, H, L, d_k)
    k = c(qkv[:, :, 1]).transpose(0, 2, 1, 3)
    v = c(qkv[:, :, 2]).transpose(0, 2, 1, 3)

    scores = jnp.einsum("bhld,bhmd->bhlm", q, k,
                        preferred_element_type=jnp.float32) * scale
    key16 = _sortable_key_from_bits(
        lax.bitcast_convert_type(scores, jnp.int32)) >> 16
    kth16 = lax.top_k(key16, top_k)[0][..., -1:]
    keep = key16 >= kth16
    attn = jax.nn.softmax(jnp.where(keep, scores, -jnp.inf), axis=-1)
    out = jnp.einsum("bhlm,bhmd->bhld", c(attn), v,
                     preferred_element_type=jnp.float32)
    out = out.transpose(0, 2, 1, 3).reshape(B, L, D)

    proj = jnp.dot(c(out), c(p["wout"]),
                   preferred_element_type=jnp.float32) + p["bout"]
    res = proj + x
    mean = jnp.mean(res, axis=-1, keepdims=True)
    var = jnp.mean((res - mean) ** 2, axis=-1, keepdims=True)
    y = (res - mean) / jnp.sqrt(var + eps)
    return y * p["gamma"] + p["beta"]


def reference_encoder(x, layer_params, norm_params, n_heads, num_layers,
                      eps=1e-5, matmul_dtype=jnp.float32):
    src = x
    for _ in range(num_layers):
        src = reference_layer(src, layer_params, n_heads, eps, matmul_dtype)
    mean = jnp.mean(src, axis=-1, keepdims=True)
    var = jnp.mean((src - mean) ** 2, axis=-1, keepdims=True)
    y = (src - mean) / jnp.sqrt(var + eps)
    return y * norm_params["gamma"] + norm_params["beta"]


def init_params(key, d_model):
    k1, k2, k3, k4 = jax.random.split(key, 4)
    s = 0.02
    return {
        "wqkv": s * jax.random.normal(k1, (d_model, 3 * d_model), jnp.float32),
        "bqkv": s * jax.random.normal(k2, (3 * d_model,), jnp.float32),
        "wout": s * jax.random.normal(k3, (d_model, d_model), jnp.float32),
        "bout": s * jax.random.normal(k4, (d_model,), jnp.float32),
        "gamma": jnp.ones((d_model,), jnp.float32),
        "beta": jnp.zeros((d_model,), jnp.float32),
    }


if __name__ == "__main__":
    B, L, d_model, n_heads, num_layers = 2, 8, 32, 4, 2

    key = jax.random.PRNGKey(0)
    kx, kp = jax.random.split(key)
    x = jax.random.normal(kx, (B, L, d_model), jnp.float32)
    layer_params = init_params(kp, d_model)
    norm_params = {"gamma": jnp.ones((d_model,), jnp.float32),
                   "beta": jnp.zeros((d_model,), jnp.float32)}

    mm_dtype = jnp.bfloat16   # bf16 MXU operands, f32 accumulation
    out = voformer_encoder(x, layer_params, norm_params, n_heads, num_layers,
                           matmul_dtype=mm_dtype)
    out = jax.block_until_ready(out)
    assert out.shape == (B, L, d_model)

    # Pure-JAX reference using the same matmul precision / top-k bucketing.
    ref = reference_encoder(x, layer_params, norm_params, n_heads, num_layers,
                            matmul_dtype=mm_dtype)
    err = float(jnp.max(jnp.abs(out - ref)))
    assert err < 1e-2, f"mismatch vs reference: {err}"

    print("KERNEL_OK")
</pallas_src>

<mosaic_0001>
module attributes {stable_mosaic.version = 11 : i64} {
  func.func @_qkv_proj_kernel(%arg0: i32, %arg1: i32, %arg2: memref<1x8x32xf32, #tpu.memory_space<vmem>>, %arg3: memref<32x96xbf16, #tpu.memory_space<vmem>>, %arg4: memref<1x96xf32, #tpu.memory_space<vmem>>, %arg5: memref<1x8x32xbf16, #tpu.memory_space<vmem>>, %arg6: memref<1x32x8xbf16, #tpu.memory_space<vmem>>, %arg7: memref<1x8x32xbf16, #tpu.memory_space<vmem>>) attributes {dimension_semantics = [#tpu.dimension_semantics<parallel>, #tpu.dimension_semantics<parallel>], iteration_bounds = array<i64: 2, 1>, scalar_prefetch = 0 : i64, scratch_operands = 0 : i64, tpu.core_type = #tpu.core_type<tc>, window_params = [{transform_indices = @transform_0, window_bounds = array<i64: 1, 8, 32>}, {pipeline_mode = #tpu.pipeline_mode<synchronous>, transform_indices = @transform_1, window_bounds = array<i64: 32, 96>}, {pipeline_mode = #tpu.pipeline_mode<synchronous>, transform_indices = @transform_2, window_bounds = array<i64: 1, 96>}, {transform_indices = @transform_3, window_bounds = array<i64: 1, 8, 32>}, {transform_indices = @transform_4, window_bounds = array<i64: 1, 32, 8>}, {transform_indices = @transform_5, window_bounds = array<i64: 1, 8, 32>}]} {
    %c0 = arith.constant 0 : index
    %c0_0 = arith.constant 0 : index
    %c0_1 = arith.constant 0 : index
    %0 = vector.load %arg2[%c0, %c0_0, %c0_1] : memref<1x8x32xf32, #tpu.memory_space<vmem>>, vector<1x8x32xf32>
    %1 = vector.shape_cast %0 : vector<1x8x32xf32> to vector<8x32xf32>
    %2 = arith.truncf %1 : vector<8x32xf32> to vector<8x32xbf16>
    %c0_2 = arith.constant 0 : index
    %c0_3 = arith.constant 0 : index
    %3 = vector.load %arg3[%c0_2, %c0_3] : memref<32x96xbf16, #tpu.memory_space<vmem>>, vector<32x96xbf16>
    %cst = arith.constant dense<0.000000e+00> : vector<8x96xf32>
    %4 = tpu.matmul %2, %3, %cst {dimension_numbers = #tpu.dot_dimension_numbers<[1], [0], [0], [1], [0, 0, 1, 1], [], []>} : vector<8x32xbf16>, vector<32x96xbf16>, vector<8x96xf32> -> vector<8x96xf32>
    %c0_4 = arith.constant 0 : index
    %c0_5 = arith.constant 0 : index
    %5 = vector.load %arg4[%c0_4, %c0_5] : memref<1x96xf32, #tpu.memory_space<vmem>>, vector<1x96xf32>
    %6 = vector.broadcast %5 : vector<1x96xf32> to vector<8x96xf32>
    %7 = arith.addf %4, %6 : vector<8x96xf32>
    %8 = vector.extract_strided_slice %7 {offsets = [0, 0], sizes = [8, 32], strides = [1, 1]} : vector<8x96xf32> to vector<8x32xf32>
    %9 = arith.truncf %8 : vector<8x32xf32> to vector<8x32xbf16>
    %c0_6 = arith.constant 0 : index
    %c0_7 = arith.constant 0 : index
    %c0_8 = arith.constant 0 : index
    %10 = vector.load %arg5[%c0_6, %c0_7, %c0_8] : memref<1x8x32xbf16, #tpu.memory_space<vmem>>, vector<1x8x32xbf16>
    %11 = vector.shape_cast %10 : vector<1x8x32xbf16> to vector<8x32xbf16>
    %12 = vector.shape_cast %9 : vector<8x32xbf16> to vector<1x8x32xbf16>
    tpu.vector_store %arg5[%c0_6, %c0_7, %c0_8], %12 {strides = array<i32>} : memref<1x8x32xbf16, #tpu.memory_space<vmem>>, vector<1x8x32xbf16>,
    %13 = vector.extract_strided_slice %7 {offsets = [0, 32], sizes = [8, 32], strides = [1, 1]} : vector<8x96xf32> to vector<8x32xf32>
    %14 = arith.truncf %13 : vector<8x32xf32> to vector<8x32xbf16>
    %15 = tpu.transpose %14, [1, 0] : vector<8x32xbf16> -> vector<32x8xbf16>
    %c0_9 = arith.constant 0 : index
    %c0_10 = arith.constant 0 : index
    %c0_11 = arith.constant 0 : index
    %16 = vector.load %arg6[%c0_9, %c0_10, %c0_11] : memref<1x32x8xbf16, #tpu.memory_space<vmem>>, vector<1x32x8xbf16>
    %17 = vector.shape_cast %16 : vector<1x32x8xbf16> to vector<32x8xbf16>
    %18 = vector.shape_cast %15 : vector<32x8xbf16> to vector<1x32x8xbf16>
    tpu.vector_store %arg6[%c0_9, %c0_10, %c0_11], %18 {strides = array<i32>} : memref<1x32x8xbf16, #tpu.memory_space<vmem>>, vector<1x32x8xbf16>,
    %19 = vector.extract_strided_slice %7 {offsets = [0, 64], sizes = [8, 32], strides = [1, 1]} : vector<8x96xf32> to vector<8x32xf32>
    %20 = arith.truncf %19 : vector<8x32xf32> to vector<8x32xbf16>
    %c0_12 = arith.constant 0 : index
    %c0_13 = arith.constant 0 : index
    %c0_14 = arith.constant 0 : index
    %21 = vector.load %arg7[%c0_12, %c0_13, %c0_14] : memref<1x8x32xbf16, #tpu.memory_space<vmem>>, vector<1x8x32xbf16>
    %22 = vector.shape_cast %21 : vector<1x8x32xbf16> to vector<8x32xbf16>
    %23 = vector.shape_cast %20 : vector<8x32xbf16> to vector<1x8x32xbf16>
    tpu.vector_store %arg7[%c0_12, %c0_13, %c0_14], %23 {strides = array<i32>} : memref<1x8x32xbf16, #tpu.memory_space<vmem>>, vector<1x8x32xbf16>,
    return
  }
  func.func @transform_0(%arg0: i32, %arg1: i32) -> (i32, i32, i32) {
    %c0_i32 = arith.constant 0 : i32
    %c0_i32_0 = arith.constant 0 : i32
    return %arg0, %arg1, %c0_i32 : i32, i32, i32
  }
  func.func @transform_1(%arg0: i32, %arg1: i32) -> (i32, i32) {
    %c0_i32 = arith.constant 0 : i32
    %c0_i32_0 = arith.constant 0 : i32
    %c0_i32_1 = arith.constant 0 : i32
    return %c0_i32, %c0_i32_0 : i32, i32
  }
  func.func @transform_2(%arg0: i32, %arg1: i32) -> (i32, i32) {
    %c0_i32 = arith.constant 0 : i32
    %c0_i32_0 = arith.constant 0 : i32
    %c0_i32_1 = arith.constant 0 : i32
    return %c0_i32, %c0_i32_0 : i32, i32
  }
  func.func @transform_3(%arg0: i32, %arg1: i32) -> (i32, i32, i32) {
    %c0_i32 = arith.constant 0 : i32
    %c0_i32_0 = arith.constant 0 : i32
    return %arg0, %arg1, %c0_i32 : i32, i32, i32
  }
  func.func @transform_4(%arg0: i32, %arg1: i32) -> (i32, i32, i32) {
    %c0_i32 = arith.constant 0 : i32
    %c0_i32_0 = arith.constant 0 : i32
    return %arg0, %c0_i32, %arg1 : i32, i32, i32
  }
  func.func @transform_5(%arg0: i32, %arg1: i32) -> (i32, i32, i32) {
    %c0_i32 = arith.constant 0 : i32
    %c0_i32_0 = arith.constant 0 : i32
    return %arg0, %arg1, %c0_i32 : i32, i32, i32
  }
}

</mosaic_0001>

<bundles_post_ra>
// kernel: tpu_custom_call.1
= control target key start
LH: loop header
LB: loop body
LE: loop exit
PB: predicated region body
PF: predicated region fallthrough
CT: control target
= control target key end

     0   :  { %11 = vsyncpa [#allocation3], 0  ;;  %s1230_s0 = inlined_call_operand.hbm [shape: f32[2,8,32], index: 0, kind: input, shape index: {}]   ;;  %s1231_s1 = inlined_call_operand.hbm [shape: bf16[32,96], index: 1, kind: input, shape index: {}]   ;;  %s1232_s2 = inlined_call_operand.vmem [shape: f32[1,96], index: 2, kind: input, shape index: {}]   ;;  %s1233_s3 = inlined_call_operand.hbm [shape: bf16[2,8,32], index: 3, kind: output, shape index: {0}]   ;;  %s1234_s4 = inlined_call_operand.vmem [shape: bf16[2,32,8], index: 4, kind: output, shape index: {1}]   ;;  %s1235_s5 = inlined_call_operand.hbm [shape: bf16[2,8,32], index: 5, kind: output, shape index: {2}]  }
   0x1   :  { %13 = vsyncpa [#allocation3 + $0x1], 0 }
   0x2   :  { %14 = vsyncpa [#allocation6], 0 }
   0x3   :  { %15 = vsyncpa [#allocation4], 0 }
   0x4   :  { %17 = vsyncpa [#allocation4 + $0x1], 0 }
   0x5   :  { %18 = vsyncpa [#allocation9], 0 }
   0x6   :  { %20 = vsyncpa [#allocation9 + $0x1], 0  ;;  %s974_s18 = smov 0   ;;  %s976_s19 = smov 0  }
   0x7   :  { %s978_s20 = smov 0   ;;  %s980_s21 = smov 0  }
   0x8   :  { %s982_s22 = smov 0   ;;  %s984_s23 = smov 0  }
   0x9 LB: > { %s627_s24 = sadd.s32 4294967295, %s932_s23   ;;  %s628_s25 = sadd.s32 4294967294, %s932_s23   ;;  %s932_s23 = sphi %s984_s23, %s26_s23   ;;  %s928_s22 = sphi %s982_s22, %s1259_s22   ;;  %s924_s21 = sphi %s980_s21, %s1258_s21   ;;  %s920_s20 = sphi %s978_s20, %s1257_s20   ;;  %s916_s19 = sphi %s976_s19, %s1256_s19   ;;  %s912_s18 = sphi %s974_s18, %s1255_s18  }
   0xa   : > { %p60_p0 = scmp.ne.s32.totalorder %s916_s19, %s912_s18  ;;  %p1008_p1 = scmp.eq.s32.totalorder %s627_s24, 0 }
   0xb   : > { %p1012_p2 = scmp.eq.s32.totalorder %s627_s24, 1  ;;  %p134_p3 = scmp.eq.s32.totalorder %s628_s25, 1 }
   0xc   : > { %s1240_s26 = scalar_select %p1008_p1, 1, 0 }
   0xd   : > { %s1241_s27 = scalar_select %p1012_p2, 1, 0 }
   0xe   : > { %p1018_p4 = por %p1008_p1, %p60_p0  ;;  %p629_p5 = scmp.ge.s32.totalorder %s932_s23, 1 }
   0xf   : > { %p1023_p6 = por %p134_p3, %p60_p0  ;;  %p197_p7 = scmp.lt.s32.totalorder %s932_s23, 3 }
  0x10   : > { %s1242_s28 = scalar_select %p1018_p4, 1, 0 }
  0x11   : > { %s1243_s29 = scalar_select %p1023_p6, 1, 0 }
  0x12   : > { %p1028_p8 = pnand %p629_p5, %p197_p7  ;;  %s934_s6 = smov [#allocation5]  }
  0x13   : > { %s209_s7 = sshll.u32 %s934_s6, 4  ;;  %s38_s9 = sadd.s32 1, %s928_s22  ;;  %s210_s7 = int_to_ptr.vmem [resolvable:$true] %s209_s7 }
  0x14   : > { %s1244_s30 = scalar_select %p1028_p8, 1, 0 }
  0x15   : > { %p679_p9 = pneg %p1028_p8  ;;  %s756_s12 = scalar_lea.hbm %s1231_s1, 256 }
  0x16   : > { %p757_p12 = scmp.ne.s32.totalorder %s1231_s1, %s756_s12  ;;  %p763_p5 = scmp.lt.u32.totalorder %s756_s12, %s1231_s1 }
  0x17   : > { %p1037_p11 = pnand %p679_p9, %p1008_p1 }
  0x19   : > { %p758_p13 = pneg %p1037_p11 }
  0x1b   : > { %p759_p0 = pnand %p758_p13, %p757_p12 }
  0x1d   : > { %p760_p3 = pneg %p759_p0 }
  0x1f   : > { %p765_p7 = pnand %p763_p5, %p760_p3 }
  0x21   : > { %768 = shalt.err (!%p765_p7)
}
  0x22   : > { %s769_s17 = scalar_lea.vmem %s210_s7, 256  ;;  %p777_p1 = scmp.lt.s32.totalorder %s210_s7, %s210_s7 }
  0x23   : > { %p770_p9 = scmp.ne.s32.totalorder %s210_s7, %s769_s17  ;;  %p778_p4 = scmp.lt.s32.totalorder %s769_s17, %s769_s17 }
  0x25   : > { %p772_p10 = pnand %p770_p9, %p758_p13  ;;  %p779_p8 = por %p778_p4, %p777_p1 }
  0x27   : > { %p773_p6 = pneg %p772_p10 }
  0x29   : > { %p780_p2 = pnand %p779_p8, %p773_p6 }
  0x2b   : > { %783 = shalt.err (!%p780_p2)
}
  0x2c   : > { %s935_s24 = smov 64   ;;  %s936_s25 = smov 4  }
  0x2d   : > { %682 = dma.hbm_to_vmem [thread:$0]  (!%p1037_p11), %s1231_s1, 256, %s210_s7, [#allocation6], %s935_s24, %s935_s24, %s936_s25  }
  0x2e   : > { %p40_p1 = scmp.ge.s32.totalorder %s38_s9, 2  ;;  %s47_s11 = sadd.s32 1, %s920_s20 }
  0x2f   : > { %p54_p2 = scmp.ne.s32.totalorder %s920_s20, %s916_s19  ;;  %p55_p4 = scmp.eq.s32.totalorder %s932_s23, 0 }
  0x30   : > { %s1261_s9 = smov (%p40_p1, %s38_s9), 0  ;;  %p1247_p8 = scmp.ne.s32.totalorder %s1241_s27, 0 }
  0x31   : > { %p1064_p6 = por %p55_p4, %p54_p2  ;;  %s42_s8 = ssub.s32 %s928_s22, %s1261_s9 }
  0x32   : > { %p1070_p10 = por %p1247_p8, %p54_p2  ;;  %p695_p12 = scmp.lt.s32.totalorder %s932_s23, 2 }
  0x33   : > { %p45_p11 = scmp.eq.s32.totalorder %s42_s8, 0  ;;  %s226_s7 = sand.u32 1, %s920_s20  }
  0x34   : > { %s632_s14 = sshll.u32 %s226_s7, 3  ;;  %s633_s16 = sshll.u32 %s928_s22, 7 }
  0x35   : > { %s1079_s15 = scalar_select %p45_p11, %s920_s20, %s47_s11  }
  0x36   : > { %s1085_s25 = scalar_lea.hbm %s1230_s0, %s633_s16  ;;  %s230_s27 = scalar_lea.vmem [#allocation2], %s632_s14 }
  0x37   : > { %s238_s6 = sshll.u32 %s230_s27, 4  ;;  %p1091_p13 = pnand %p695_p12, %p1064_p6  ;;  %s1087_s6 = int_to_ptr.vmem [resolvable:$true] %s238_s6 }
  0x38   : > { %s227_s11 = scalar_lea.sflag [#allocation3], %s226_s7  ;;  %s784_s8 = scalar_lea.hbm %s1085_s25, 128 }
  0x39   : > { %p785_p0 = scmp.ne.s32.totalorder %s1085_s25, %s784_s8  ;;  %p786_p3 = pneg %p1091_p13 }
  0x3a   : > { %s789_s17 = scalar_lea.hbm %s1230_s0, 256  ;;  %p790_p9 = scmp.lt.u32.totalorder %s1085_s25, %s1230_s0 }
  0x3b   : > { %p787_p5 = pnand %p786_p3, %p785_p0  ;;  %p791_p1 = scmp.lt.u32.totalorder %s789_s17, %s784_s8 }
  0x3c   : > { %p793_p4 = scmp.lt.u32.totalorder %s784_s8, %s1085_s25 }
  0x3d   : > { %p788_p7 = pneg %p787_p5  ;;  %p792_p2 = por %p791_p1, %p790_p9 }
  0x3f   : > { %p794_p6 = por %p793_p4, %p792_p2 }
  0x41   : > { %p795_p8 = pnand %p794_p6, %p788_p7 }
  0x43   : > { %798 = shalt.err (!%p795_p8)
}
  0x44   : > { %s799_s7 = scalar_lea.vmem %s1087_s6, 128  ;;  %s937_s27 = smov [#allocation2]  }
  0x45   : > { %p800_p12 = scmp.ne.s32.totalorder %s1087_s6, %s799_s7  ;;  %s804_s14 = sshll.u32 %s937_s27, 4  ;;  %s805_s14 = int_to_ptr.vmem [resolvable:$false] %s804_s14 }
  0x46   : > { %s806_s16 = scalar_lea.vmem %s805_s14, 256  ;;  %p807_p5 = scmp.lt.s32.totalorder %s1087_s6, %s805_s14 }
  0x47   : > { %p802_p11 = pnand %p800_p12, %p786_p3  ;;  %p808_p9 = scmp.lt.s32.totalorder %s806_s16, %s799_s7 }
  0x49   : > { %p803_p0 = pneg %p802_p11  ;;  %p809_p1 = por %p808_p9, %p807_p5 }
  0x4b   : > { %p810_p2 = pnand %p809_p1, %p803_p0 }
  0x4d   : > { %813 = shalt.err (!%p810_p2)
}
  0x4e   : > { %686 = dma.hbm_to_vmem [thread:$0]  (!%p1091_p13), %s1085_s25, 128, %s1087_s6, %s227_s11  }
  0x4f   : > { %p1250_p7 = scmp.ne.s32.totalorder %s1244_s30, 0 }
  0x50   : > { %s1123_s8 = sand.u32 (!%p1250_p7), 1, %s916_s19   ;;  %p1251_p3 = scmp.ne.s32.totalorder (!%p1250_p7), %s1242_s28, 0 }
  0x51   : > { %247 = sbr.rel (%p1250_p7) target bundleno = 542 (0x21e), region = 32  ;;  %s635_s17 = sshll.u32 (!%p1250_p7), %s1123_s8, 3 }
  0x52   : > { %s250_s12 = scalar_lea.sflag (!%p1250_p7), [#allocation3], %s1123_s8  ;;  %s253_s24 = scalar_lea.vmem (!%p1250_p7), [#allocation2], %s635_s17 }
  0x58   : > { %895 = dma.done.wait (%p1251_p3), %s250_s12, 128  }
  0x59   : > { %897 = vsyncadd (%p1251_p3), %s250_s12, 4294967168  ;;  %p1252_p4 = scmp.ne.s32.totalorder %s1240_s26, 0 }
  0x5b   : > { %899 = dma.done.wait (%p1252_p4), [#allocation6], 256  }
  0x5c   : > { %901 = vsyncadd (%p1252_p4), [#allocation6], 4294967040  ;;  %v938_v0 = vmov 0.0   ;;  %vm939_vm0 = vmmov 0   ;;  %v754_v1 = vld [vmem:[#allocation5] sm:$0xff]   ;;  %v755_v2 = vld [vmem:[#allocation5 + $0x8] sm:$0xff]  }
  0x5d   : > { %661 = vmatprep.subr.bf16.mxu0 %v938_v0  ;;  %665 = vmatprep.mubr.msk.bf16.mxu0 %vm939_vm0, %v938_v0  ;;  %v306_v3 = vld [vmem:[%s253_s24] sm:$0xff]  ;;  %vm331_vm1 = vcmask 261120   ;;  %s637_s26 = sshll.u32 %s1123_s8, 2  ;;  %vm376_vm2 = vcmask 257024   ;;  %s940_s25 = smov 96  }
  0x5e   : > { %662 = vmatpush3.bf16.msra.mxu0 %v754_v1  ;;  %v307_v4 = vpack.c.bf16 %v306_v3, %v306_v3  ;;  %v641_v5 = vld [vmem:[%s1232_s2] ss:$0 sm:$0xff]  ;;  %s279_s6 = scalar_lea.vmem [#allocation7], %s637_s26  ;;  %s941_s10 = smov 64  }
  0x5f   : > { %663 = vmatprep.subr.bf16.mxu0 %v938_v0  ;;  %s652_s11 = sshll.u32 %s924_s21, 6  ;;  %s451_s7 = sshll.u32 %s279_s6, 4  ;;  %s452_s7 = int_to_ptr.vmem [resolvable:$true] %s451_s7 }
  0x60   : > { %s1148_s16 = scalar_lea.hbm %s1233_s3, %s652_s11  ;;  %s424_s17 = scalar_lea.sflag [#allocation4], %s1123_s8 }
  0x61   : > { %s814_s12 = scalar_lea.vmem %s452_s7, 64  ;;  %s942_s24 = smov [#allocation7]  }
  0x62   : > { %664 = vmatpush3.bf16.msra.mxu0 %v755_v2  ;;  %p815_p13 = scmp.ne.s32.totalorder %s452_s7, %s814_s12  ;;  %s818_s28 = sshll.u32 %s942_s24, 4  ;;  %s819_s28 = int_to_ptr.vmem [resolvable:$false] %s818_s28 }
  0x63   : > { %s820_s30 = scalar_lea.vmem %s819_s28, 128  ;;  %p821_p12 = scmp.lt.s32.totalorder %s452_s7, %s819_s28 }
  0x64   : > { %p816_p6 = pnand %p815_p13, %p1070_p10  ;;  %p822_p11 = scmp.lt.s32.totalorder %s820_s30, %s814_s12 }
  0x65   : > { %666 = vmatmul.mubr.msk.bf16.vlgmr.msra.gmra.mrb[0].mxu0 %vm331_vm1, %v307_v4 }
  0x66   : > { %p817_p8 = pneg %p816_p6  ;;  %p823_p0 = por %p822_p11, %p821_p12 }
  0x68   : > { %p824_p5 = pnand %p823_p0, %p817_p8 }
 0x138   : > { %v369_v6 = vpop.f32.mrb[0].mxu0 }
 0x139   : > { %v370_v7 = vadd.f32 %v641_v5, %v369_v6  ;;  %v667_v8 = vpop.f32.mrb[1].mxu0 }
 0x13a   : > { %v372_v9 = vpop.f32.mrb[2].mxu0 }
 0x13b   : > { %v375_v10 = vpack.c.bf16 %v370_v7, %v370_v7  ;;  %v668_v11 = vpop.f32.mrb[3].mxu0 }
 0x13d   : > { %379 = vrot.lane.b32.xlu0 %v375_v10, %s940_s25  ;;  %377 = vst.msk [vmem:[%s279_s6] sm:$0xf] %vm376_vm2, %v375_v10 }
 0x141   : > { %419 = vrot.lane.b32.xlu0 %v375_v10, %s941_s10 }
 0x142   : > { %827 = shalt.err (!%p824_p5)
}
 0x143   : > { %s828_s25 = scalar_lea.hbm %s1148_s16, 64  ;;  %s832_s27 = scalar_lea.hbm %s1233_s3, 128 }
 0x144   : > { %p829_p9 = scmp.ne.s32.totalorder %s1148_s16, %s828_s25  ;;  %p833_p7 = scmp.lt.u32.totalorder %s1148_s16, %s1233_s3 }
 0x145   : > { %p834_p3 = scmp.lt.u32.totalorder %s832_s27, %s828_s25  ;;  %p836_p13 = scmp.lt.u32.totalorder %s828_s25, %s1148_s16 }
 0x146   : > { %p830_p1 = pnand %p829_p9, %p1070_p10 }
 0x147   : > { %p835_p4 = por %p834_p3, %p833_p7 }
 0x148   : > { %p831_p2 = pneg %p830_p1 }
 0x149   : > { %p837_p6 = por %p836_p13, %p835_p4 }
 0x14b   : > { %p838_p8 = pnand %p837_p6, %p831_p2 }
 0x14d   : > { %841 = shalt.err (!%p838_p8)
}
 0x14e   : > { %675 = dma.vmem_to_hbm [thread:$0]  (%p1070_p10), %s452_s7, 64, %s1148_s16, %s424_s17  }
 0x14f   : > { %s296_s12 = scalar_lea.vmem [#allocation8], %s637_s26  ;;  %s1175_s25 = scalar_lea.hbm %s1235_s5, %s652_s11 }
 0x150   : > { %s468_s28 = sshll.u32 %s296_s12, 4  ;;  %s437_s7 = scalar_lea.sflag [#allocation9], %s1123_s8  ;;  %s1177_s28 = int_to_ptr.vmem [resolvable:$true] %s468_s28 }
 0x151   : > { %s842_s16 = scalar_lea.vmem %s1177_s28, 64  ;;  %s943_s26 = smov [#allocation8]  }
 0x152   : > { %p843_p12 = scmp.ne.s32.totalorder %s1177_s28, %s842_s16  ;;  %s846_s17 = sshll.u32 %s943_s26, 4  ;;  %s847_s17 = int_to_ptr.vmem [resolvable:$false] %s846_s17 }
 0x153   : > { %s848_s10 = scalar_lea.vmem %s847_s17, 128  ;;  %p849_p5 = scmp.lt.s32.totalorder %s1177_s28, %s847_s17 }
 0x154   : > { %p844_p11 = pnand %p843_p12, %p1070_p10  ;;  %p850_p9 = scmp.lt.s32.totalorder %s848_s10, %s842_s16 }
 0x156   : > { %p845_p0 = pneg %p844_p11  ;;  %p851_p1 = por %p850_p9, %p849_p5 }
 0x158   : > { %p852_p2 = pnand %p851_p1, %p845_p0 }
 0x1af   : > { %v380_v12 = vpop.permute.xlu0 %379 }
 0x1b0   : > { %382 = vxpose.xlu1.c.b16.start.end [1/1] (short) (narrow) %v380_v12, 32 }
 0x1b3   : > { %v420_v13 = vpop.permute.xlu0 %419 }
 0x1b4   : > { %422 = vst.msk [vmem:[%s296_s12] sm:$0xf] %vm376_vm2, %v420_v13 }
 0x1b5   : > { %855 = shalt.err (!%p852_p2)
}
 0x1b6   : > { %s856_s8 = scalar_lea.hbm %s1175_s25, 64  ;;  %s860_s14 = scalar_lea.hbm %s1235_s5, 128 }
 0x1b7   : > { %p857_p7 = scmp.ne.s32.totalorder %s1175_s25, %s856_s8  ;;  %p861_p13 = scmp.lt.u32.totalorder %s1175_s25, %s1235_s5 }
 0x1b8   : > { %p862_p6 = scmp.lt.u32.totalorder %s860_s14, %s856_s8  ;;  %p864_p12 = scmp.lt.u32.totalorder %s856_s8, %s1175_s25 }
 0x1b9   : > { %p858_p3 = pnand %p857_p7, %p1070_p10 }
 0x1ba   : > { %p863_p8 = por %p862_p6, %p861_p13 }
 0x1bb   : > { %p859_p4 = pneg %p858_p3 }
 0x1bc   : > { %p865_p11 = por %p864_p12, %p863_p8 }
 0x1be   : > { %p866_p0 = pnand %p865_p11, %p859_p4 }
 0x1c0   : > { %869 = shalt.err (!%p866_p0)
}
 0x1c1   : > { %676 = dma.vmem_to_hbm [thread:$0]  (%p1070_p10), %s1177_s28, 64, %s1175_s25, %s437_s7   ;;  %vm412_vm3 = vcmask 60416  }
 0x1c2   : > { %p297_p5 = scmp.lt.s32.totalorder %s924_s21, 1 }
 0x1c4   : > { %s1263_s21 = smov (!%p297_p5, %s924_s21), 1 }
 0x1c5   : > { %s656_s30 = sshll.u32 %s1263_s21, 4 }
 0x1c6   : > { %s304_s26 = scalar_lea.vmem %s1234_s4, %s656_s30 }
 0x216   : > { %v390_v14 = vpop.trf.xlu1 }
 0x217   : > { %v645_v15 = vcombine.low %v390_v14, %v390_v14  ;;  %v646_v16 = vcombine.high %v390_v14, %v390_v14 }
 0x219   : > { %413 = vst.msk [vmem:[%s304_s26] sm:$0xf] %vm412_vm3, %v645_v15  ;;  %414 = vst.msk [vmem:[%s304_s26 + $0x4] sm:$0xf] %vm412_vm3, %v646_v16 }
 0x21a   : > { %v391_v17 = vpop.trf.xlu1 }
 0x21b   : > { %v647_v18 = vcombine.low %v391_v17, %v391_v17  ;;  %v648_v19 = vcombine.high %v391_v17, %v391_v17 }
 0x21d   : > { %415 = vst.msk [vmem:[%s304_s26 + $0x8] sm:$0xf] %vm412_vm3, %v647_v18  ;;  %416 = vst.msk [vmem:[%s304_s26 + $0xc] sm:$0xf] %vm412_vm3, %v648_v19 }
 0x21e PF: > { %s480_s21 = sand.u32 1, %s912_s18   ;;  %p1253_p10 = scmp.ne.s32.totalorder %s1243_s29, 0 }
 0x21f   : > { %p1254_p9 = scmp.ge.s32.totalorder %s932_s23, 2  ;;  %s481_s13 = scalar_lea.sflag [#allocation4], %s480_s21 }
 0x221   : > { %p688_p1 = pnand %p1254_p9, %p1253_p10 }
 0x223   : > { %903 = dma.done.wait (!%p688_p1), %s481_s13, 64  }
 0x224   : > { %905 = vsyncadd (!%p688_p1), %s481_s13, 4294967232  ;;  %s501_s28 = scalar_lea.sflag [#allocation9], %s480_s21 }
 0x225   : > { %907 = dma.done.wait (!%p688_p1), %s501_s28, 64  }
 0x226   : > { %909 = vsyncadd (!%p688_p1), %s501_s28, 4294967232  ;;  %s26_s23 = sadd.s32 1, %s932_s23   ;;  %s1255_s18 = smov %s916_s19 }
 0x227   : > { %p23_p2 = scmp.ge.s32.totalorder %s26_s23, 4   ;;  %s1256_s19 = smov %s920_s20 }
 0x228   : > { %s1257_s20 = smov %s1079_s15  ;;  %s1258_s21 = smov %s928_s22 }
 0x229   : > { %s1259_s22 = smov %s1261_s9  ;;  %25 = sbr.rel (!%p23_p2) target bundleno = 9 (0x9), region = 110 }
 0x230   :  { %506 = vsyncpa [#allocation3], 1 }
 0x231   :  { %508 = vsyncpa [#allocation3 + $0x1], 1 }
 0x232   :  { %509 = vsyncpa [#allocation6], 1 }
 0x233   :  { %510 = vsyncpa [#allocation4], 1 }
 0x234   :  { %512 = vsyncpa [#allocation4 + $0x1], 1 }
 0x235   :  { %513 = vsyncpa [#allocation9], 1 }
 0x236   :  { %515 = vsyncpa [#allocation9 + $0x1], 1 }

</bundles_post_ra>
